<compile_context>
chip_gen: v6e
topology: v6e:2x2x1
jax: 0.10.0
libtpu: 0.0.40
codegen_flags: <defaults>
</compile_context>

<pallas_src>
import functools

import jax
import jax.numpy as jnp
from jax import lax
from jax.experimental import pallas as pl
from jax.experimental.pallas import tpu as pltpu

_LANE = 128


def _round_up(x, m):
    return ((x + m - 1) // m) * m


def _dice_kernel(pred_ref, tgt_ref, inter_ref, union_ref, inter_acc, union_acc,
                 *, valid_s, tile_s, tiles_per_chunk, may_need_mask):
    # pred_ref : (1, C, TS)    logits tile (original dtype; cast to f32 in-register)
    # tgt_ref  : (1, 1, TS)    integer label tile
    # inter_ref/union_ref : (1, 1, C, 1) f32 partial sums for this (n, chunk)
    # inter_acc/union_acc : (C, TS) f32 lane-dense accumulators: pure VPU adds
    #   per tile; the single cross-lane XLU reduction happens in the epilogue.
    g = pl.program_id(1)
    s = pl.program_id(2)
    n_s = pl.num_programs(2)
    C = pred_ref.shape[1]
    TS = pred_ref.shape[2]

    @pl.when(s == 0)
    def _():
        inter_acc[...] = jnp.zeros_like(inter_acc)
        union_acc[...] = jnp.zeros_like(union_acc)

    x = pred_ref[0].astype(jnp.float32)               # (C, TS) f32 in-register cast
    t = tgt_ref[0].astype(jnp.int32)                  # (1, TS)

    # `target < ns` masking from the reference (invalid labels -> 0, logits -> 0).
    label_valid = t < C                               # (1, TS) bool
    t_m = jnp.where(label_valid, t, 0)                # (1, TS)
    x_m = jnp.where(label_valid, x, 0.0)              # (C, TS)

    # Softmax over the channel (sublane) axis; one divide per lane.
    m = jnp.max(x_m, axis=0, keepdims=True)           # (1, TS)
    e = jnp.exp(x_m - m)                              # (C, TS)
    inv = 1.0 / jnp.sum(e, axis=0, keepdims=True)     # (1, TS)
    p = e * inv                                       # (C, TS)

    # One-hot as a boolean compare, fused into the accumulation selects below.
    ch = lax.broadcasted_iota(jnp.int32, (C, 1), 0)   # (C, 1)
    onehot_b = ch == t_m                              # (C, TS) bool

    lt = g * tiles_per_chunk + s                      # logical spatial tile index

    if may_need_mask:
        # Only tiles whose lane window extends past valid_s pay the lane-mask
        # VALU cost; interior tiles take the cheap path.
        needs_mask = (lt + 1) * tile_s > valid_s

        @pl.when(jnp.logical_not(needs_mask))
        def _():
            inter_acc[...] += jnp.where(onehot_b, p, 0.0)
            union_acc[...] += jnp.where(onehot_b, p + 1.0, p)

        @pl.when(needs_mask)
        def _():
            # INVARIANT: padded / duplicated lanes contain undefined data that
            # has only flowed through lane-local ops so far; they must be
            # zeroed here, before the (cross-lane) epilogue reduction.
            lane_ids = lax.broadcasted_iota(jnp.int32, (1, TS), 1)
            lane_valid = (lt * tile_s + lane_ids) < valid_s       # (1, TS)
            pv = jnp.where(lane_valid, p, 0.0)
            sel = jnp.logical_and(onehot_b, lane_valid)
            inter_acc[...] += jnp.where(sel, pv, 0.0)
            union_acc[...] += jnp.where(sel, pv + 1.0, pv)
    else:
        inter_acc[...] += jnp.where(onehot_b, p, 0.0)
        union_acc[...] += jnp.where(onehot_b, p + 1.0, p)

    @pl.when(s == n_s - 1)
    def _():
        # Single cross-lane reduction per (batch row, chunk).
        inter_ref[0, 0] = jnp.sum(inter_acc[...], axis=-1, keepdims=True)
        union_ref[0, 0] = jnp.sum(union_acc[...], axis=-1, keepdims=True)


def dice_loss(output_nchw, target_nhw, *, smooth=1.0, max_lanes_per_tile=None):
    """Pallas implementation of DiceLoss.forward (defaults: gdice=False, p=1, C >= 2)."""
    # TODO(synk): binary (C == 1) branch, g_dice weighting and p > 1 union
    # variants of dice_coff are not implemented (DiceLoss defaults only).
    N, C, H, W = output_nchw.shape
    assert C >= 2, "only the multi-class (softmax) branch is implemented"
    S = H * W

    # Keep original dtypes: inputs are DMA'd as-is and cast to f32 in-register.
    pred = output_nchw.reshape(N, C, S)
    tgt = target_nhw.reshape(N, 1, S)
    if not jnp.issubdtype(tgt.dtype, jnp.integer):
        tgt = tgt.astype(jnp.int32)
    itemsize = jnp.dtype(pred.dtype).itemsize
    tgt_itemsize = jnp.dtype(tgt.dtype).itemsize
    c_pad = _round_up(C, 8)           # sublane padding of the f32 accumulators

    # ---- Spatial tile size ---------------------------------------------------
    # Target ~4 MiB of pred per block (well past the per-step-overhead knee on
    # every generation), clamped so 2x double-buffered inputs + sublane-padded
    # f32 accumulators + margin fit a v7x-safe budget (64 MiB physical VMEM).
    pred_block_target = 4 * 1024 * 1024
    vmem_budget = 40 * 1024 * 1024
    vmem_margin = 8 * 1024 * 1024     # fixed headroom for outputs/compiler scratch
    per_lane_bytes = 2 * C * itemsize + 2 * tgt_itemsize + 2 * c_pad * 4
    ts_from_target = pred_block_target // max(C * itemsize, 1)
    ts_from_budget = (vmem_budget - vmem_margin) // per_lane_bytes
    TS = min(_round_up(S, _LANE),
             max(_LANE, (min(ts_from_target, ts_from_budget) // _LANE) * _LANE))
    if max_lanes_per_tile is not None:   # testing hook to force multi-tile paths
        TS = min(TS, max(_LANE, (max_lanes_per_tile // _LANE) * _LANE))
    n_tiles = pl.cdiv(S, TS)

    # ---- Megacore: if the batch axis alone can't shard evenly across v7x's two
    # TensorCores, split the spatial tiles into 2 parallel chunks (harmless on
    # single-TC chips; partials are combined in the wrapper).
    G = 2 if (N % 2 == 1 and n_tiles >= 2) else 1
    TPC = pl.cdiv(n_tiles, G)                 # spatial tiles per chunk
    need_clamp = G * TPC > n_tiles            # last chunk may have phantom tiles
    may_need_mask = (G * TPC * TS) != S       # any tile extends past S?

    def in_map(n, g, s):
        t = g * TPC + s
        if need_clamp:
            # Phantom tiles re-read the last real tile; their lanes are fully
            # masked off in the kernel, so they contribute zero.
            t = jnp.minimum(t, n_tiles - 1)
        return (n, 0, t)

    kernel = functools.partial(
        _dice_kernel,
        valid_s=S,
        tile_s=TS,
        tiles_per_chunk=TPC,
        may_need_mask=may_need_mask,
    )

    # Honest VMEM accounting: 2x (double-buffered) per input block, sublane-
    # padded f32 accumulators, plus a fixed margin (no arbitrary 16 MiB floor).
    block_bytes = 2 * (C * TS * itemsize) + 2 * (TS * tgt_itemsize)
    acc_bytes = 2 * c_pad * TS * 4
    vmem_limit = int(min(block_bytes + acc_bytes + vmem_margin, 48 * 1024 * 1024))

    cost = pl.CostEstimate(
        flops=int(12 * N * C * S),
        transcendentals=int(N * C * S),
        bytes_accessed=int(pred.size * itemsize + tgt.size * tgt_itemsize
                           + 2 * N * G * C * 4),
    )

    inter_p, union_p = pl.pallas_call(
        kernel,
        out_shape=(jax.ShapeDtypeStruct((N, G, C, 1), jnp.float32),
                   jax.ShapeDtypeStruct((N, G, C, 1), jnp.float32)),
        grid_spec=pltpu.PrefetchScalarGridSpec(
            num_scalar_prefetch=0,
            grid=(N, G, TPC),
            in_specs=[
                pl.BlockSpec((1, C, TS), in_map),
                pl.BlockSpec((1, 1, TS), in_map),
            ],
            out_specs=[
                pl.BlockSpec((1, 1, C, 1), lambda n, g, s: (n, g, 0, 0)),
                pl.BlockSpec((1, 1, C, 1), lambda n, g, s: (n, g, 0, 0)),
            ],
            scratch_shapes=[
                pltpu.VMEM((C, TS), jnp.float32),
                pltpu.VMEM((C, TS), jnp.float32),
            ],
        ),
        compiler_params=pltpu.CompilerParams(
            dimension_semantics=("parallel", "parallel", "arbitrary"),
            vmem_limit_bytes=vmem_limit,
        ),
        cost_estimate=cost,
    )(pred, tgt)

    # Trivial glue in plain JAX: combine chunk partials and form the loss.
    inter = jnp.sum(inter_p[..., 0], axis=1)      # (N, C)
    union = jnp.sum(union_p[..., 0], axis=1)      # (N, C)
    coff = (2.0 * inter + smooth) / (union + smooth)
    return jnp.mean(1.0 - coff)


def _dice_loss_ref(output_nchw, target_nhw, *, smooth=1.0):
    """Pure-JAX reference mirroring the PyTorch code (C >= 2, gdice=False, p=1)."""
    N, C, H, W = output_nchw.shape
    mask = target_nhw < C
    target = target_nhw * mask
    out = output_nchw * mask[:, None].astype(output_nchw.dtype)
    out = jax.nn.softmax(out, axis=1)
    onehot = jax.nn.one_hot(target, C, axis=1, dtype=jnp.float32)
    out = out.reshape(N, C, -1)
    onehot = onehot.reshape(N, C, -1)
    inter = jnp.sum(out * onehot, axis=-1)
    union = jnp.sum(out + onehot, axis=-1)
    coff = (2.0 * inter + smooth) / (union + smooth)
    return jnp.mean(1.0 - coff)


if __name__ == "__main__":
    key = jax.random.PRNGKey(0)
    k_out, k_tgt = jax.random.split(key)

    # Primary shape from the module spec (single full tile, unmasked fast path).
    N, C, H, W = 2, 4, 16, 16
    output = jax.random.normal(k_out, (N, C, H, W), dtype=jnp.float32)
    # labels in [0, C]; values == C exercise the `target < ns` masking path
    target = jax.random.randint(k_tgt, (N, H, W), 0, C + 1, dtype=jnp.int32)

    loss = jax.block_until_ready(dice_loss(output, target, smooth=1.0))
    ref = _dice_loss_ref(output, target, smooth=1.0)
    assert jnp.allclose(loss, ref, atol=1e-5), (loss, ref)

    # Partial final block (S = 100 < TS = 128), no wrapper-side padding.
    k_out2, k_tgt2 = jax.random.split(k_out)
    output2 = jax.random.normal(k_out2, (2, 4, 10, 10), dtype=jnp.float32)
    target2 = jax.random.randint(k_tgt2, (2, 10, 10), 0, 5, dtype=jnp.int32)

    loss2 = jax.block_until_ready(dice_loss(output2, target2, smooth=1.0))
    ref2 = _dice_loss_ref(output2, target2, smooth=1.0)
    assert jnp.allclose(loss2, ref2, atol=1e-5), (loss2, ref2)

    # Multi-tile + megacore chunk split (N odd), forced small tile to exercise
    # the interior-unmasked / last-tile-masked / clamped-phantom-tile paths.
    k_out3, k_tgt3 = jax.random.split(k_out2)
    output3 = jax.random.normal(k_out3, (1, 4, 18, 18), dtype=jnp.float32)
    target3 = jax.random.randint(k_tgt3, (1, 18, 18), 0, 5, dtype=jnp.int32)

    loss3 = jax.block_until_ready(
        dice_loss(output3, target3, smooth=1.0, max_lanes_per_tile=128))
    ref3 = _dice_loss_ref(output3, target3, smooth=1.0)
    assert jnp.allclose(loss3, ref3, atol=1e-5), (loss3, ref3)

    print("KERNEL_OK")
</pallas_src>

<mosaic_0001>
module attributes {stable_mosaic.version = 11 : i64} {
  func.func @_dice_kernel(%arg0: i32, %arg1: i32, %arg2: i32, %arg3: memref<1x4x256xf32, #tpu.memory_space<vmem>>, %arg4: memref<1x1x256xi32, #tpu.memory_space<vmem>>, %arg5: memref<1x1x4x1xf32, #tpu.memory_space<vmem>>, %arg6: memref<1x1x4x1xf32, #tpu.memory_space<vmem>>, %arg7: memref<4x256xf32, #tpu.memory_space<vmem>>, %arg8: memref<4x256xf32, #tpu.memory_space<vmem>>) attributes {dimension_semantics = [#tpu.dimension_semantics<parallel>, #tpu.dimension_semantics<parallel>, #tpu.dimension_semantics<arbitrary>], iteration_bounds = array<i64: 2, 1, 1>, scalar_prefetch = 0 : i64, scratch_operands = 2 : i64, tpu.core_type = #tpu.core_type<tc>, window_params = [{transform_indices = @transform_0, window_bounds = array<i64: 1, 4, 256>}, {transform_indices = @transform_1, window_bounds = array<i64: 1, 1, 256>}, {transform_indices = @transform_2, window_bounds = array<i64: 1, 1, 4, 1>}, {transform_indices = @transform_3, window_bounds = array<i64: 1, 1, 4, 1>}]} {
    %c0_i32 = arith.constant 0 : i32
    %0 = arith.cmpi eq, %arg2, %c0_i32 : i32
    %1 = arith.extui %0 : i1 to i32
    %c0_i32_0 = arith.constant 0 : i32
    %2 = arith.cmpi ne, %1, %c0_i32_0 : i32
    scf.if %2 {
      %cst_22 = arith.constant 0.000000e+00 : f32
      %44 = vector.broadcast %cst_22 : f32 to vector<4x256xf32>
      %c0_23 = arith.constant 0 : index
      %c0_24 = arith.constant 0 : index
      %45 = vector.load %arg7[%c0_23, %c0_24] : memref<4x256xf32, #tpu.memory_space<vmem>>, vector<4x256xf32>
      tpu.vector_store %arg7[%c0_23, %c0_24], %44 {strides = array<i32>} : memref<4x256xf32, #tpu.memory_space<vmem>>, vector<4x256xf32>,
      %cst_25 = arith.constant 0.000000e+00 : f32
      %46 = vector.broadcast %cst_25 : f32 to vector<4x256xf32>
      %c0_26 = arith.constant 0 : index
      %c0_27 = arith.constant 0 : index
      %47 = vector.load %arg8[%c0_26, %c0_27] : memref<4x256xf32, #tpu.memory_space<vmem>>, vector<4x256xf32>
      tpu.vector_store %arg8[%c0_26, %c0_27], %46 {strides = array<i32>} : memref<4x256xf32, #tpu.memory_space<vmem>>, vector<4x256xf32>,
    } else {
    }
    %c0 = arith.constant 0 : index
    %c0_1 = arith.constant 0 : index
    %c0_2 = arith.constant 0 : index
    %3 = vector.load %arg3[%c0, %c0_1, %c0_2] : memref<1x4x256xf32, #tpu.memory_space<vmem>>, vector<1x4x256xf32>
    %4 = vector.shape_cast %3 : vector<1x4x256xf32> to vector<4x256xf32>
    %c0_3 = arith.constant 0 : index
    %c0_4 = arith.constant 0 : index
    %c0_5 = arith.constant 0 : index
    %5 = vector.load %arg4[%c0_3, %c0_4, %c0_5] : memref<1x1x256xi32, #tpu.memory_space<vmem>>, vector<1x1x256xi32>
    %6 = vector.shape_cast %5 : vector<1x1x256xi32> to vector<1x256xi32>
    %c4_i32 = arith.constant 4 : i32
    %7 = vector.broadcast %c4_i32 : i32 to vector<1x256xi32>
    %8 = arith.cmpi slt, %6, %7 : vector<1x256xi32>
    %c0_i32_6 = arith.constant 0 : i32
    %9 = vector.broadcast %c0_i32_6 : i32 to vector<1x256xi32>
    %10 = arith.select %8, %6, %9 : vector<1x256xi1>, vector<1x256xi32>
    %cst = arith.constant 0.000000e+00 : f32
    %11 = vector.shape_cast %8 : vector<1x256xi1> to vector<1x256xi1>
    %12 = vector.broadcast %11 : vector<1x256xi1> to vector<4x256xi1>
    %13 = vector.broadcast %cst : f32 to vector<4x256xf32>
    %14 = arith.select %12, %4, %13 : vector<4x256xi1>, vector<4x256xf32>
    %cst_7 = arith.constant dense<0xFF800000> : vector<256xf32>
    %15 = vector.multi_reduction <maximumf>, %14, %cst_7 [0] : vector<4x256xf32> to vector<256xf32>
    %16 = vector.shape_cast %15 : vector<256xf32> to vector<1x256xf32>
    %17 = vector.broadcast %16 : vector<1x256xf32> to vector<4x256xf32>
    %18 = arith.subf %14, %17 : vector<4x256xf32>
    %19 = math.exp %18 : vector<4x256xf32>
    %cst_8 = arith.constant dense<0.000000e+00> : vector<256xf32>
    %20 = vector.multi_reduction <add>, %19, %cst_8 [0] : vector<4x256xf32> to vector<256xf32>
    %21 = vector.shape_cast %20 : vector<256xf32> to vector<1x256xf32>
    %cst_9 = arith.constant 1.000000e+00 : f32
    %22 = vector.broadcast %cst_9 : f32 to vector<1x256xf32>
    %23 = arith.divf %22, %21 : vector<1x256xf32>
    %24 = vector.broadcast %23 : vector<1x256xf32> to vector<4x256xf32>
    %25 = arith.mulf %19, %24 : vector<4x256xf32>
    %26 = tpu.iota {dimensions = array<i32: 0>} : vector<4x1xi32>
    %27 = vector.broadcast %26 : vector<4x1xi32> to vector<4x256xi32>
    %28 = vector.broadcast %10 : vector<1x256xi32> to vector<4x256xi32>
    %29 = arith.cmpi eq, %27, %28 : vector<4x256xi32>
    %c0_10 = arith.constant 0 : index
    %c0_11 = arith.constant 0 : index
    %30 = vector.load %arg7[%c0_10, %c0_11] : memref<4x256xf32, #tpu.memory_space<vmem>>, vector<4x256xf32>
    %cst_12 = arith.constant 0.000000e+00 : f32
    %31 = vector.broadcast %cst_12 : f32 to vector<4x256xf32>
    %32 = arith.select %29, %25, %31 : vector<4x256xi1>, vector<4x256xf32>
    %33 = arith.addf %30, %32 : vector<4x256xf32>
    %c0_13 = arith.constant 0 : index
    %c0_14 = arith.constant 0 : index
    %34 = vector.load %arg7[%c0_13, %c0_14] : memref<4x256xf32, #tpu.memory_space<vmem>>, vector<4x256xf32>
    tpu.vector_store %arg7[%c0_13, %c0_14], %33 {strides = array<i32>} : memref<4x256xf32, #tpu.memory_space<vmem>>, vector<4x256xf32>,
    %c0_15 = arith.constant 0 : index
    %c0_16 = arith.constant 0 : index
    %35 = vector.load %arg8[%c0_15, %c0_16] : memref<4x256xf32, #tpu.memory_space<vmem>>, vector<4x256xf32>
    %cst_17 = arith.constant 1.000000e+00 : f32
    %36 = vector.broadcast %cst_17 : f32 to vector<4x256xf32>
    %37 = arith.addf %25, %36 : vector<4x256xf32>
    %38 = arith.select %29, %37, %25 : vector<4x256xi1>, vector<4x256xf32>
    %39 = arith.addf %35, %38 : vector<4x256xf32>
    %c0_18 = arith.constant 0 : index
    %c0_19 = arith.constant 0 : index
    %40 = vector.load %arg8[%c0_18, %c0_19] : memref<4x256xf32, #tpu.memory_space<vmem>>, vector<4x256xf32>
    tpu.vector_store %arg8[%c0_18, %c0_19], %39 {strides = array<i32>} : memref<4x256xf32, #tpu.memory_space<vmem>>, vector<4x256xf32>,
    %c0_i32_20 = arith.constant 0 : i32
    %41 = arith.cmpi eq, %arg2, %c0_i32_20 : i32
    %42 = arith.extui %41 : i1 to i32
    %c0_i32_21 = arith.constant 0 : i32
    %43 = arith.cmpi ne, %42, %c0_i32_21 : i32
    scf.if %43 {
      %c0_22 = arith.constant 0 : index
      %c0_23 = arith.constant 0 : index
      %44 = vector.load %arg7[%c0_22, %c0_23] : memref<4x256xf32, #tpu.memory_space<vmem>>, vector<4x256xf32>
      %cst_24 = arith.constant dense<0.000000e+00> : vector<4xf32>
      %45 = vector.multi_reduction <add>, %44, %cst_24 [1] : vector<4x256xf32> to vector<4xf32>
      %46 = vector.shape_cast %45 : vector<4xf32> to vector<4x1xf32>
      %c0_25 = arith.constant 0 : index
      %c0_26 = arith.constant 0 : index
      %c0_27 = arith.constant 0 : index
      %c0_28 = arith.constant 0 : index
      %47 = vector.load %arg5[%c0_25, %c0_26, %c0_27, %c0_28] : memref<1x1x4x1xf32, #tpu.memory_space<vmem>>, vector<1x1x4x1xf32>
      %48 = vector.shape_cast %47 : vector<1x1x4x1xf32> to vector<4x1xf32>
      %49 = vector.shape_cast %46 : vector<4x1xf32> to vector<1x1x4x1xf32>
      tpu.vector_store %arg5[%c0_25, %c0_26, %c0_27, %c0_28], %49 {strides = array<i32>} : memref<1x1x4x1xf32, #tpu.memory_space<vmem>>, vector<1x1x4x1xf32>,
      %c0_29 = arith.constant 0 : index
      %c0_30 = arith.constant 0 : index
      %50 = vector.load %arg8[%c0_29, %c0_30] : memref<4x256xf32, #tpu.memory_space<vmem>>, vector<4x256xf32>
      %cst_31 = arith.constant dense<0.000000e+00> : vector<4xf32>
      %51 = vector.multi_reduction <add>, %50, %cst_31 [1] : vector<4x256xf32> to vector<4xf32>
      %52 = vector.shape_cast %51 : vector<4xf32> to vector<4x1xf32>
      %c0_32 = arith.constant 0 : index
      %c0_33 = arith.constant 0 : index
      %c0_34 = arith.constant 0 : index
      %c0_35 = arith.constant 0 : index
      %53 = vector.load %arg6[%c0_32, %c0_33, %c0_34, %c0_35] : memref<1x1x4x1xf32, #tpu.memory_space<vmem>>, vector<1x1x4x1xf32>
      %54 = vector.shape_cast %53 : vector<1x1x4x1xf32> to vector<4x1xf32>
      %55 = vector.shape_cast %52 : vector<4x1xf32> to vector<1x1x4x1xf32>
      tpu.vector_store %arg6[%c0_32, %c0_33, %c0_34, %c0_35], %55 {strides = array<i32>} : memref<1x1x4x1xf32, #tpu.memory_space<vmem>>, vector<1x1x4x1xf32>,
    } else {
    }
    return
  }
  func.func @transform_0(%arg0: i32, %arg1: i32, %arg2: i32) -> (i32, i32, i32) {
    %c1_i32 = arith.constant 1 : i32
    %0 = arith.muli %arg1, %c1_i32 : i32
    %1 = arith.addi %0, %arg2 : i32
    %c0_i32 = arith.constant 0 : i32
    %c0_i32_0 = arith.constant 0 : i32
    return %arg0, %c0_i32, %1 : i32, i32, i32
  }
  func.func @transform_1(%arg0: i32, %arg1: i32, %arg2: i32) -> (i32, i32, i32) {
    %c1_i32 = arith.constant 1 : i32
    %0 = arith.muli %arg1, %c1_i32 : i32
    %1 = arith.addi %0, %arg2 : i32
    %c0_i32 = arith.constant 0 : i32
    %c0_i32_0 = arith.constant 0 : i32
    return %arg0, %c0_i32, %1 : i32, i32, i32
  }
  func.func @transform_2(%arg0: i32, %arg1: i32, %arg2: i32) -> (i32, i32, i32, i32) {
    %c0_i32 = arith.constant 0 : i32
    %c0_i32_0 = arith.constant 0 : i32
    %c0_i32_1 = arith.constant 0 : i32
    return %arg0, %arg1, %c0_i32, %c0_i32_0 : i32, i32, i32, i32
  }
  func.func @transform_3(%arg0: i32, %arg1: i32, %arg2: i32) -> (i32, i32, i32, i32) {
    %c0_i32 = arith.constant 0 : i32
    %c0_i32_0 = arith.constant 0 : i32
    %c0_i32_1 = arith.constant 0 : i32
    return %arg0, %arg1, %c0_i32, %c0_i32_0 : i32, i32, i32, i32
  }
}

</mosaic_0001>

<bundles_post_ra>
// kernel: tpu_custom_call.1
= control target key start
LH: loop header
LB: loop body
LE: loop exit
PB: predicated region body
PF: predicated region fallthrough
CT: control target
= control target key end

     0   :  { %9 = vsyncpa [#allocation5], 0  ;;  %s943_s0 = inlined_call_operand.hbm [shape: f32[2,4,256], index: 0, kind: input, shape index: {}]   ;;  %s944_s1 = inlined_call_operand.hbm [shape: s32[2,1,256], index: 1, kind: input, shape index: {}]   ;;  %s945_s2 = inlined_call_operand.vmem [shape: f32[2,1,4,1], index: 2, kind: output, shape index: {0}]   ;;  %s946_s3 = inlined_call_operand.vmem [shape: f32[2,1,4,1], index: 3, kind: output, shape index: {1}]  }
   0x1   :  { %11 = vsyncpa [#allocation5 + $0x1], 0 }
   0x2   :  { %12 = vsyncpa [#allocation7], 0 }
   0x3   :  { %14 = vsyncpa [#allocation7 + $0x1], 0  ;;  %s796_s12 = smov 0   ;;  %s798_s13 = smov 0  }
   0x4   :  { %s800_s14 = smov 0   ;;  %s802_s15 = smov 0  }
   0x5   :  { %s804_s16 = smov 0   ;;  %s806_s17 = smov 0  }
   0x6 LB: > { %s570_s18 = sadd.s32 4294967295, %s771_s17   ;;  %s39_s19 = sadd.s32 1, %s767_s16  ;;  %s771_s17 = sphi %s806_s17, %s20_s17   ;;  %s767_s16 = sphi %s804_s16, %s955_s16   ;;  %s763_s15 = sphi %s802_s15, %s954_s15   ;;  %s759_s14 = sphi %s800_s14, %s953_s14   ;;  %s755_s13 = sphi %s798_s13, %s952_s13   ;;  %s751_s12 = sphi %s796_s12, %s951_s12  }
   0x7   : > { %p41_p0 = scmp.ge.s32.totalorder %s39_s19, 2  ;;  %s50_s20 = sadd.s32 1, %s759_s14 }
   0x8   : > { %p57_p1 = scmp.ne.s32.totalorder %s759_s14, %s755_s13  ;;  %p58_p2 = scmp.eq.s32.totalorder %s771_s17, 0 }
   0x9   : > { %s957_s19 = smov (%p41_p0, %s39_s19), 0  ;;  %p63_p4 = scmp.ne.s32.totalorder %s755_s13, %s751_s12 }
   0xa   : > { %p832_p3 = por %p58_p2, %p57_p1  ;;  %s45_s22 = ssub.s32 %s767_s16, %s957_s19 }
   0xb   : > { %p64_p5 = scmp.eq.s32.totalorder %s570_s18, 0  ;;  %p48_p6 = scmp.eq.s32.totalorder %s45_s22, 0 }
   0xc   : > { %p602_p8 = scmp.lt.s32.totalorder %s771_s17, 2  ;;  %s848_s25 = sand.u32 1, %s759_s14  }
   0xd   : > { %p839_p7 = por %p64_p5, %p63_p4  ;;  %s587_s26 = sshll.u32 %s767_s16, 7 }
   0xe   : > { %s845_s24 = scalar_select %p48_p6, %s759_s14, %s50_s20  }
   0xf   : > { %s574_s27 = sshll.u32 %s848_s25, 3  ;;  %s186_s30 = scalar_lea.hbm %s943_s0, %s587_s26 }
  0x10   : > { %s177_s4 = scalar_lea.vmem [#allocation4], %s574_s27  ;;  %p857_p9 = pnand %p602_p8, %p832_p3 }
  0x11   : > { %s188_s5 = sshll.u32 %s177_s4, 4  ;;  %p580_p10 = scmp.ge.s32.totalorder %s771_s17, 1  ;;  %s189_s5 = int_to_ptr.vmem [resolvable:$true] %s188_s5 }
  0x12   : > { %p215_p11 = scmp.lt.s32.totalorder %s771_s17, 3  ;;  %s174_s7 = scalar_lea.sflag [#allocation5], %s848_s25 }
  0x13   : > { %p663_p12 = pneg %p857_p9  ;;  %s674_s8 = scalar_lea.vmem %s189_s5, 128 }
  0x14   : > { %p675_p13 = scmp.ne.s32.totalorder %s189_s5, %s674_s8  ;;  %s773_s9 = smov [#allocation4]  }
  0x15   : > { %s679_s10 = sshll.u32 %s773_s9, 4  ;;  %s680_s10 = int_to_ptr.vmem [resolvable:$false] %s679_s10 }
  0x16   : > { %p677_p0 = pnand %p675_p13, %p663_p12  ;;  %s681_s11 = scalar_lea.vmem %s680_s10, 256 }
  0x17   : > { %p682_p2 = scmp.lt.s32.totalorder %s189_s5, %s680_s10  ;;  %p683_p3 = scmp.lt.s32.totalorder %s681_s11, %s674_s8 }
  0x18   : > { %p678_p1 = pneg %p677_p0 }
  0x19   : > { %p684_p4 = por %p683_p3, %p682_p2 }
  0x1b   : > { %p685_p5 = pnand %p684_p4, %p678_p1 }
  0x1d   : > { %688 = shalt.err (!%p685_p5)
}
  0x1e   : > { %598 = dma.hbm_to_vmem [thread:$0]  (!%p857_p9), %s186_s30, 128, %s189_s5, %s174_s7  }
  0x1f   : > { %p875_p6 = pnand %p580_p10, %p215_p11  ;;  %s577_s18 = sshll.u32 %s848_s25, 1 }
  0x20   : > { %s588_s20 = sshll.u32 %s767_s16, 5  ;;  %s199_s27 = scalar_lea.vmem [#allocation6], %s577_s18 }
  0x21   : > { %s208_s26 = scalar_lea.hbm %s944_s1, %s588_s20  ;;  %s210_s28 = sshll.u32 %s199_s27, 4  ;;  %s211_s28 = int_to_ptr.vmem [resolvable:$true] %s210_s28 }
  0x22   : > { %s196_s29 = scalar_lea.sflag [#allocation7], %s848_s25  ;;  %s702_s4 = scalar_lea.vmem %s211_s28, 32 }
  0x23   : > { %p703_p8 = scmp.ne.s32.totalorder %s211_s28, %s702_s4  ;;  %s774_s30 = smov [#allocation6]  }
  0x24   : > { %s707_s5 = sshll.u32 %s774_s30, 4  ;;  %s708_s5 = int_to_ptr.vmem [resolvable:$false] %s707_s5 }
  0x25   : > { %p705_p13 = pnand %p703_p8, %p663_p12  ;;  %s709_s7 = scalar_lea.vmem %s708_s5, 64 }
  0x26   : > { %p710_p10 = scmp.lt.s32.totalorder %s211_s28, %s708_s5  ;;  %p711_p11 = scmp.lt.s32.totalorder %s709_s7, %s702_s4 }
  0x27   : > { %p706_p0 = pneg %p705_p13 }
  0x28   : > { %p712_p1 = por %p711_p11, %p710_p10 }
  0x2a   : > { %p713_p2 = pnand %p712_p1, %p706_p0 }
  0x2c   : > { %716 = shalt.err (!%p713_p2)
}
  0x2d   : > { %601 = dma.hbm_to_vmem [thread:$0]  (!%p857_p9), %s208_s26, 32, %s211_s28, %s196_s29  }
  0x2e   : > { %219 = sbr.rel (%p875_p6) target bundleno = 275 (0x113), region = 28  ;;  %s221_s25 = sand.u32 (!%p875_p6), 1, %s755_s13  }
  0x2f   : > { %s581_s8 = sshll.u32 (!%p875_p6), %s221_s25, 3  ;;  %s222_s9 = scalar_lea.sflag (!%p875_p6), [#allocation5], %s221_s25 }
  0x30   : > { %s225_s10 = scalar_lea.vmem (!%p875_p6), [#allocation4], %s581_s8 }
  0x33   : > { %742 = dma.done.wait (%p839_p7), %s222_s9, 128  }
  0x34   : > { %744 = vsyncadd (%p839_p7), %s222_s9, 4294967168  ;;  %s582_s11 = sshll.u32 %s221_s25, 1  ;;  %s231_s18 = scalar_lea.sflag [#allocation7], %s221_s25 }
  0x35   : > { %s234_s20 = scalar_lea.vmem [#allocation6], %s582_s11 }
  0x36   : > { %746 = dma.done.wait (%p839_p7), %s231_s18, 32  }
  0x37   : > { %748 = vsyncadd (%p839_p7), %s231_s18, 4294967264  ;;  %v300_v0 = vlaneseq  ;;  %v295_v4 = vld [vmem:[%s225_s10] sm:$0xff]  ;;  %v296_v5 = vld [vmem:[%s234_s20] sm:$0x3]  ;;  %v775_v6 = vmov 0   ;;  %vm315_vm1 = vcmask 1043456  }
  0x38   : > { %vm297_vm0 = vcmp.lt.s32.totalorder %v296_v5, 4  ;;  %v311_v8 = vcombine.high %v295_v4, %v295_v4  ;;  %p275_p7 = scmp.lt.s32.totalorder %s763_s15, 1  ;;  %vm400_vm6 = vcmask 3072  }
  0x39   : > { %v901_v1 = vshrl.u32 %v300_v0, 7  ;;  %v299_v7 = vsel %vm297_vm0, 1, %v775_v6  ;;  %v298_v47 = vsel %vm297_vm0, %v296_v5, 0 }
  0x3a   : > { %s959_s15 = smov (!%p275_p7, %s763_s15), 1 }
  0x3b   : > { %v302_v2 = vsub.s32 0, %v901_v1  ;;  %v306_v3 = vsub.s32 1, %v901_v1  ;;  %s583_s23 = sshll.u32 %s959_s15, 2 }
  0x3c   : > { %s281_s21 = scalar_lea.vmem %s945_s2, %s583_s23  ;;  %s288_s27 = scalar_lea.vmem %s946_s3, %s583_s23 }
  0x3d   : > { %v303_v9 = vrot.slane %v299_v7, %v302_v2  ;;  %v307_v10 = vrot.slane %v299_v7, %v306_v3  ;;  %v361_v48 = vrot.slane %v298_v47, %v302_v2  ;;  %v365_v49 = vrot.slane %v298_v47, %v306_v3 }
  0x3f   : > { %vm308_vm2 = vcmp.eq.s32.totalorder %v303_v9, 1  ;;  %vm309_vm3 = vcmp.eq.s32.totalorder %v307_v10, 1  ;;  %vm366_vm4 = vcmp.eq.s32.totalorder %v901_v1, %v361_v48  ;;  %vm367_vm5 = vcmp.eq.s32.totalorder %v901_v1, %v365_v49 }
  0x40   : > { %v313_v11 = vsel %vm308_vm2, %v295_v4, 0.0  ;;  %v314_v12 = vsel %vm309_vm3, %v311_v8, 0.0 }
  0x41   : > { %v316_v13 = vsel %vm315_vm1, %v313_v11, -inf  ;;  %v323_v14 = vsel %vm315_vm1, %v314_v12, -inf }
  0x42   : > { %v317_v15 = vrot.slane %v316_v13, 4  ;;  %v324_v16 = vrot.slane %v323_v14, 4 }
  0x44   : > { %v318_v17 = vmax.f32 %v316_v13, %v317_v15  ;;  %v325_v18 = vmax.f32 %v323_v14, %v324_v16 }
  0x46   : > { %v319_v19 = vrot.slane %v318_v17, 2  ;;  %v326_v20 = vrot.slane %v325_v18, 2 }
  0x48   : > { %v320_v21 = vmax.f32 %v318_v17, %v319_v19  ;;  %v327_v22 = vmax.f32 %v325_v18, %v326_v20 }
  0x4a   : > { %v321_v23 = vrot.slane %v320_v21, 1  ;;  %v328_v24 = vrot.slane %v327_v22, 1 }
  0x4c   : > { %v322_v25 = vmax.f32 %v320_v21, %v321_v23  ;;  %v329_v26 = vmax.f32 %v327_v22, %v328_v24 }
  0x4e   : > { %v330_v27 = vsub.f32 %v313_v11, %v322_v25  ;;  %v331_v28 = vsub.f32 %v314_v12, %v329_v26 }
  0x50   : > { %v332_v29 = vmul.f32 1.442695, %v330_v27  ;;  %v334_v30 = vmul.f32 1.442695, %v331_v28 }
  0x52   : > { %653 = vpow2.f32 %v332_v29 }
  0x53   : > { %655 = vpow2.f32 %v334_v30 }
  0x5f   : > { %v654_v31 = vpop.eup %653 }
  0x60   : > { %v656_v32 = vpop.eup %655  ;;  %v336_v33 = vsel %vm315_vm1, %v654_v31, 0.0 }
  0x61   : > { %v337_v34 = vrot.slane %v336_v33, 4  ;;  %v343_v35 = vsel %vm315_vm1, %v656_v32, 0.0 }
  0x62   : > { %v344_v36 = vrot.slane %v343_v35, 4 }
  0x63   : > { %v338_v37 = vadd.f32 %v337_v34, %v336_v33 }
  0x64   : > { %v345_v38 = vadd.f32 %v344_v36, %v343_v35 }
  0x65   : > { %v339_v39 = vrot.slane %v338_v37, 2 }
  0x66   : > { %v346_v40 = vrot.slane %v345_v38, 2 }
  0x67   : > { %v340_v41 = vadd.f32 %v339_v39, %v338_v37 }
  0x68   : > { %v347_v42 = vadd.f32 %v346_v40, %v345_v38 }
  0x69   : > { %v341_v43 = vrot.slane %v340_v41, 1 }
  0x6a   : > { %v348_v44 = vrot.slane %v347_v42, 1 }
  0x6b   : > { %v342_v45 = vadd.f32 %v341_v43, %v340_v41 }
  0x6c   : > { %v349_v46 = vadd.f32 %v348_v44, %v347_v42 }
  0x6d   : > { %657 = vrcp.f32 %v342_v45 }
  0x6e   : > { %659 = vrcp.f32 %v349_v46 }
  0x7a   : > { %v658_v50 = vpop.eup %657 }
  0x7b   : > { %v660_v51 = vpop.eup %659  ;;  %v354_v52 = vmul.f32 %v658_v50, %v654_v31 }
  0x7c   : > { %v355_v53 = vmul.f32 %v660_v51, %v656_v32 }
  0x7d   : > { %v369_v54 = vsel %vm366_vm4, %v354_v52, 0.0  ;;  %v378_v55 = vadd.f32 1.0, %v354_v52 }
  0x7e   : > { %v370_v56 = vsel %vm367_vm5, %v355_v53, 0.0  ;;  %v379_v57 = vadd.f32 1.0, %v355_v53 }
  0x7f   : > { %v373_v58 = vcombine.low %v369_v54, %v370_v56  ;;  %v589_v59 = vcombine.low %v370_v56, %v370_v56  ;;  %v380_v60 = vsel %vm366_vm4, %v378_v55, %v354_v52 }
  0x80   : > { %v381_v61 = vsel %vm367_vm5, %v379_v57, %v355_v53 }
  0x81   : > { %v395_v62 = vsel %vm315_vm1, %v373_v58, 0.0  ;;  %v396_v63 = vsel %vm315_vm1, %v589_v59, 0.0  ;;  %v384_v0 = vcombine.low %v380_v60, %v381_v61  ;;  %v590_v2 = vcombine.low %v381_v61, %v381_v61 }
  0x82   : > { %v397_v3 = vadd.f32 %v396_v63, %v395_v62 }
  0x83   : > { %v406_v1 = vsel %vm315_vm1, %v384_v0, 0.0  ;;  %v407_v4 = vsel %vm315_vm1, %v590_v2, 0.0 }
  0x84   : > { %398 = vadd.xlane.f32.xlu0 %v397_v3  ;;  %v408_v5 = vadd.f32 %v407_v4, %v406_v1 }
  0x88   : > { %409 = vadd.xlane.f32.xlu0 %v408_v5 }
 0x10d   : > { %v399_v6 = vpop.xlane.xlu0 %398 }
 0x10e   : > { %401 = vst.msk [vmem:[%s281_s21] sm:$0xf] %vm400_vm6, %v399_v6 }
 0x111   : > { %v410_v7 = vpop.xlane.xlu0 %409 }
 0x112   : > { %411 = vst.msk [vmem:[%s288_s27] sm:$0xf] %vm400_vm6, %v410_v7 }
 0x113 PF: > { %s20_s17 = sadd.s32 1, %s771_s17   ;;  %s951_s12 = smov %s755_s13 }
 0x114   : > { %p17_p9 = scmp.ge.s32.totalorder %s20_s17, 4   ;;  %s952_s13 = smov %s759_s14 }
 0x115   : > { %s953_s14 = smov %s845_s24  ;;  %s954_s15 = smov %s767_s16 }
 0x116   : > { %s955_s16 = smov %s957_s19  ;;  %19 = sbr.rel (!%p17_p9) target bundleno = 6 (0x6), region = 101 }
 0x11b   :  { %457 = vsyncpa [#allocation5], 1 }
 0x11c   :  { %459 = vsyncpa [#allocation5 + $0x1], 1 }
 0x11d   :  { %460 = vsyncpa [#allocation7], 1 }
 0x11e   :  { %462 = vsyncpa [#allocation7 + $0x1], 1 }

</bundles_post_ra>
